<compile_context>
chip_gen: v6e
topology: v6e:2x2x1
jax: 0.10.0
libtpu: 0.0.40
codegen_flags: <defaults>
</compile_context>

<pallas_src>
import functools

import jax
import jax.numpy as jnp
from jax.experimental import pallas as pl
from jax.experimental.pallas import tpu as pltpu

LANE = 128
SUBLANE = 8
FALLBACK_VMEM_CAPACITY = 64 * 1024 * 1024  # conservative: v7x per-TC VMEM


def _round_up(x: int, m: int) -> int:
    return (x + m - 1) // m * m


def _vmem_capacity_bytes() -> int:
    try:
        info = pltpu.get_tpu_info()
        cap = getattr(info, "vmem_capacity_bytes", None)
        if cap:
            return int(cap)
    except Exception:
        pass
    return FALLBACK_VMEM_CAPACITY


# --------------------------------------------------------------------------
# Kernel
# --------------------------------------------------------------------------
def _mlp_kernel(*refs, num_layers: int, sigmoid_output: bool, compute_dtype):
    # refs = (x_ref, w0_ref, b0_ref, w1_ref, b1_ref, ..., out_ref)
    x_ref = refs[0]
    out_ref = refs[-1]
    param_refs = refs[1:-1]

    # Cast to the MXU compute dtype inside the kernel (saves a wrapper HBM pass).
    h = x_ref[...].astype(compute_dtype)            # (TM, in_dim) -> bf16
    for i in range(num_layers):
        w = param_refs[2 * i][...]                  # (in_i, out_i), bf16, resident
        b = param_refs[2 * i + 1][...]              # (1, out_i), f32, resident
        acc = jnp.dot(h, w, preferred_element_type=jnp.float32) + b
        if i < num_layers - 1:
            h = jnp.maximum(acc, 0.0).astype(compute_dtype)  # f32 ReLU, bf16 for next dot
        else:
            h = acc
    if sigmoid_output:
        h = jax.nn.sigmoid(h)                       # f32 EUP path (v5e-safe)
    out_ref[...] = h.astype(out_ref.dtype)


# --------------------------------------------------------------------------
# Parameter preparation (hoisted out of the forward path)
# --------------------------------------------------------------------------
def prepare_mlp_params(weights, biases, *, compute_dtype=jnp.bfloat16):
    """Transpose to (in, out), lane-pad only interior (hidden) dims, cast once.

    weights: list of (out_i, in_i) arrays (PyTorch nn.Linear convention)
    biases:  list of (out_i,) arrays
    Boundary dims (kernel input / final output) are left exact so x and the
    output need no padding or slicing.
    """
    num_layers = len(weights)
    dims_in = [int(w.shape[1]) for w in weights]
    dims_out = [int(w.shape[0]) for w in weights]

    ws, bs = [], []
    for i, (w, b) in enumerate(zip(weights, biases)):
        di, do = dims_in[i], dims_out[i]
        pi = di if i == 0 else _round_up(di, LANE)
        po = do if i == num_layers - 1 else _round_up(do, LANE)
        wt = jnp.asarray(w, jnp.float32).T                      # (in, out)
        wt = jnp.pad(wt, ((0, pi - di), (0, po - do)))          # zero padding
        ws.append(wt.astype(compute_dtype))
        bp = jnp.pad(jnp.asarray(b, jnp.float32), (0, po - do))
        bs.append(bp.reshape(1, po))                            # f32 bias row

    return {
        "weights": tuple(ws),
        "biases": tuple(bs),
        "in_dim": dims_in[0],
        "out_dim": dims_out[-1],
        "dims_in": tuple(dims_in),
        "dims_out": tuple(dims_out),
        "compute_dtype": compute_dtype,
    }


def _choose_tile_m(m: int, params, out_itemsize: int) -> tuple[int, int]:
    """Largest TM (multiple of 8) fitting the generation-aware VMEM budget."""
    capacity = _vmem_capacity_bytes()
    budget = capacity * 3 // 4                      # ~25% headroom under physical
    in_dim = params["in_dim"]
    out_dim = params["out_dim"]
    act_bytes = jnp.dtype(params["compute_dtype"]).itemsize
    max_w = max([in_dim] + [int(w.shape[1]) for w in params["weights"]])
    # Count params double-buffered (worst case, covers the Buffered(1) fallback).
    param_bytes = sum(int(a.size) * a.dtype.itemsize
                      for a in params["weights"] + params["biases"])

    def est(tm):
        x_io = 2 * tm * in_dim * 4                  # double-buffered f32 x tile
        o_io = 2 * tm * out_dim * out_itemsize      # double-buffered out tile
        live = tm * max_w * (4 + act_bytes)         # f32 acc + bf16 h live together
        scratch = tm * max_w * 4                    # Mosaic matmul / misc slack
        return x_io + o_io + live + scratch + 2 * param_bytes

    # Keep >= 2 grid steps so v7x's two TensorCores both get work.
    tm_cap = _round_up(pl.cdiv(m, 2), SUBLANE) if m > SUBLANE else SUBLANE
    tm = SUBLANE
    for cand in (8, 16, 32, 64, 128, 256, 512, 1024, 2048, 4096, 8192):
        if cand > tm_cap:
            break
        if est(cand) <= budget:
            tm = cand
    vmem_limit = int(min(capacity * 17 // 20,
                         max(2 * est(tm), 32 * 1024 * 1024)))
    return tm, vmem_limit


# --------------------------------------------------------------------------
# Forward
# --------------------------------------------------------------------------
def mlp_forward(x, params, *, sigmoid_output: bool = False, out_dtype=None):
    """x: (..., input_dim); params: output of prepare_mlp_params."""
    *lead, in_dim = x.shape
    assert in_dim == params["in_dim"], "input feature dim mismatch"
    m = 1
    for d in lead:
        m *= d

    num_layers = len(params["weights"])
    out_dim = params["out_dim"]
    out_dtype = x.dtype if out_dtype is None else out_dtype
    compute_dtype = params["compute_dtype"]

    x2 = x.reshape(m, in_dim)                       # no cast, no feature pad
    m_run = m
    if m < SUBLANE:                                 # tiny-batch corner case only
        x2 = jnp.pad(x2, ((0, SUBLANE - m), (0, 0)))
        m_run = SUBLANE

    tm, vmem_limit = _choose_tile_m(m_run, params, jnp.dtype(out_dtype).itemsize)
    grid = (pl.cdiv(m_run, tm),)                    # ragged last block is masked

    args = [x2]
    for w, b in zip(params["weights"], params["biases"]):
        args.append(w)
        args.append(b)

    x_spec = pl.BlockSpec((tm, in_dim), lambda i: (i, 0))

    def resident_specs(single_buffer: bool):
        # Constant index_map: weights/biases stay resident across grid steps.
        specs = []
        for w, b in zip(params["weights"], params["biases"]):
            if single_buffer:
                specs.append(pl.BlockSpec(w.shape, lambda i: (0, 0),
                                          pipeline_mode=pl.Buffered(1)))
                specs.append(pl.BlockSpec(b.shape, lambda i: (0, 0),
                                          pipeline_mode=pl.Buffered(1)))
            else:
                specs.append(pl.BlockSpec(w.shape, lambda i: (0, 0)))
                specs.append(pl.BlockSpec(b.shape, lambda i: (0, 0)))
        return specs

    kernel = functools.partial(
        _mlp_kernel, num_layers=num_layers, sigmoid_output=sigmoid_output,
        compute_dtype=compute_dtype,
    )

    flops = 2 * m * sum(di * do for di, do in
                        zip(params["dims_in"], params["dims_out"]))
    transcendentals = m * out_dim if sigmoid_output else 0
    bytes_accessed = (int(x2.size) * x2.dtype.itemsize
                      + sum(int(a.size) * a.dtype.itemsize
                            for a in params["weights"] + params["biases"])
                      + m_run * out_dim * jnp.dtype(out_dtype).itemsize)
    cost = pl.CostEstimate(flops=flops, transcendentals=transcendentals,
                           bytes_accessed=bytes_accessed)

    def run(single_buffer: bool):
        return pl.pallas_call(
            kernel,
            out_shape=jax.ShapeDtypeStruct((m_run, out_dim), out_dtype),
            grid=grid,
            in_specs=[x_spec] + resident_specs(single_buffer),
            out_specs=pl.BlockSpec((tm, out_dim), lambda i: (i, 0)),
            compiler_params=pltpu.CompilerParams(
                dimension_semantics=("parallel",),   # shard rows over v7x's 2 TCs
                vmem_limit_bytes=vmem_limit,
            ),
            cost_estimate=cost,
        )(*args)

    try:
        # Single-buffer the grid-invariant weights/biases (halves their VMEM).
        out = run(single_buffer=True)
    except Exception:
        # Fallback if pipeline_mode=pl.Buffered(1) is unsupported here.
        out = run(single_buffer=False)

    if m_run != m:
        out = out[:m]
    return out.reshape(*lead, out_dim)


# --------------------------------------------------------------------------
# Init + reference (pure JAX, f32) for validation
# --------------------------------------------------------------------------
def init_mlp_params(key, input_dim, hidden_dim, output_dim, num_layers):
    h = [hidden_dim] * (num_layers - 1)
    dims_in = [input_dim] + h
    dims_out = h + [output_dim]
    weights, biases = [], []
    for n, k in zip(dims_in, dims_out):
        key, wk, bk = jax.random.split(key, 3)
        bound = 1.0 / (n ** 0.5)
        weights.append(jax.random.uniform(wk, (k, n), jnp.float32, -bound, bound))
        biases.append(jax.random.uniform(bk, (k,), jnp.float32, -bound, bound))
    return weights, biases


def mlp_reference(x, weights, biases, *, sigmoid_output: bool = False):
    num_layers = len(weights)
    h = x
    for i, (w, b) in enumerate(zip(weights, biases)):
        h = h @ w.T + b
        if i < num_layers - 1:
            h = jnp.maximum(h, 0.0)
    if sigmoid_output:
        h = jax.nn.sigmoid(h)
    return h


if __name__ == "__main__":
    key = jax.random.PRNGKey(0)

    input_dim, hidden_dim, output_dim, num_layers = 32, 32, 16, 3
    key, pk = jax.random.split(key)
    weights, biases = init_mlp_params(
        pk, input_dim, hidden_dim, output_dim, num_layers
    )
    params = prepare_mlp_params(weights, biases)  # one-time prep (bf16, padded)

    # bf16 MXU operands (f32 accumulation) -> ~1e-3..1e-2 agreement vs f32 ref.
    ATOL = RTOL = 2e-2

    # Case A: SAM-like small token batch, both sigmoid settings.
    key, xk = jax.random.split(key)
    x = jax.random.normal(xk, (2, 8, input_dim), jnp.float32)
    for sig in (False, True):
        out = jax.block_until_ready(mlp_forward(x, params, sigmoid_output=sig))
        ref = mlp_reference(x, weights, biases, sigmoid_output=sig)
        assert out.shape == (2, 8, output_dim)
        assert jnp.allclose(out, ref, atol=ATOL, rtol=RTOL)

    # Case B: larger M to exercise multi-step grid + ragged last block.
    key, xk = jax.random.split(key)
    xb = jax.random.normal(xk, (3, 100, input_dim), jnp.float32)
    outb = jax.block_until_ready(mlp_forward(xb, params, sigmoid_output=True))
    refb = mlp_reference(xb, weights, biases, sigmoid_output=True)
    assert outb.shape == (3, 100, output_dim)
    assert jnp.allclose(outb, refb, atol=ATOL, rtol=RTOL)

    print("KERNEL_OK")
</pallas_src>

<mosaic_0001>
module attributes {stable_mosaic.version = 11 : i64} {
  func.func @_mlp_kernel(%arg0: i32, %arg1: memref<8x32xf32, #tpu.memory_space<vmem>>, %arg2: memref<32x128xbf16, #tpu.memory_space<vmem>>, %arg3: memref<1x128xf32, #tpu.memory_space<vmem>>, %arg4: memref<128x128xbf16, #tpu.memory_space<vmem>>, %arg5: memref<1x128xf32, #tpu.memory_space<vmem>>, %arg6: memref<128x16xbf16, #tpu.memory_space<vmem>>, %arg7: memref<1x16xf32, #tpu.memory_space<vmem>>, %arg8: memref<8x16xf32, #tpu.memory_space<vmem>>) attributes {dimension_semantics = [#tpu.dimension_semantics<parallel>], iteration_bounds = array<i64: 2>, scalar_prefetch = 0 : i64, scratch_operands = 0 : i64, tpu.core_type = #tpu.core_type<tc>, window_params = [{transform_indices = @transform_0, window_bounds = array<i64: 8, 32>}, {pipeline_mode = #tpu.pipeline_mode<synchronous>, transform_indices = @transform_1, window_bounds = array<i64: 32, 128>}, {pipeline_mode = #tpu.pipeline_mode<synchronous>, transform_indices = @transform_2, window_bounds = array<i64: 1, 128>}, {pipeline_mode = #tpu.pipeline_mode<synchronous>, transform_indices = @transform_3, window_bounds = array<i64: 128, 128>}, {pipeline_mode = #tpu.pipeline_mode<synchronous>, transform_indices = @transform_4, window_bounds = array<i64: 1, 128>}, {pipeline_mode = #tpu.pipeline_mode<synchronous>, transform_indices = @transform_5, window_bounds = array<i64: 128, 16>}, {pipeline_mode = #tpu.pipeline_mode<synchronous>, transform_indices = @transform_6, window_bounds = array<i64: 1, 16>}, {transform_indices = @transform_7, window_bounds = array<i64: 8, 16>}]} {
    %c0 = arith.constant 0 : index
    %c0_0 = arith.constant 0 : index
    %0 = vector.load %arg1[%c0, %c0_0] : memref<8x32xf32, #tpu.memory_space<vmem>>, vector<8x32xf32>
    %1 = arith.truncf %0 : vector<8x32xf32> to vector<8x32xbf16>
    %c0_1 = arith.constant 0 : index
    %c0_2 = arith.constant 0 : index
    %2 = vector.load %arg2[%c0_1, %c0_2] : memref<32x128xbf16, #tpu.memory_space<vmem>>, vector<32x128xbf16>
    %c0_3 = arith.constant 0 : index
    %c0_4 = arith.constant 0 : index
    %3 = vector.load %arg3[%c0_3, %c0_4] : memref<1x128xf32, #tpu.memory_space<vmem>>, vector<1x128xf32>
    %cst = arith.constant dense<0.000000e+00> : vector<8x128xf32>
    %4 = tpu.matmul %1, %2, %cst {dimension_numbers = #tpu.dot_dimension_numbers<[1], [0], [0], [1], [0, 0, 1, 1], [], []>} : vector<8x32xbf16>, vector<32x128xbf16>, vector<8x128xf32> -> vector<8x128xf32>
    %5 = vector.broadcast %3 : vector<1x128xf32> to vector<8x128xf32>
    %6 = arith.addf %4, %5 : vector<8x128xf32>
    %cst_5 = arith.constant 0.000000e+00 : f32
    %7 = vector.broadcast %cst_5 : f32 to vector<8x128xf32>
    %8 = arith.maximumf %6, %7 : vector<8x128xf32>
    %9 = arith.truncf %8 : vector<8x128xf32> to vector<8x128xbf16>
    %c0_6 = arith.constant 0 : index
    %c0_7 = arith.constant 0 : index
    %10 = vector.load %arg4[%c0_6, %c0_7] : memref<128x128xbf16, #tpu.memory_space<vmem>>, vector<128x128xbf16>
    %c0_8 = arith.constant 0 : index
    %c0_9 = arith.constant 0 : index
    %11 = vector.load %arg5[%c0_8, %c0_9] : memref<1x128xf32, #tpu.memory_space<vmem>>, vector<1x128xf32>
    %cst_10 = arith.constant dense<0.000000e+00> : vector<8x128xf32>
    %12 = tpu.matmul %9, %10, %cst_10 {dimension_numbers = #tpu.dot_dimension_numbers<[1], [0], [0], [1], [0, 0, 1, 1], [], []>} : vector<8x128xbf16>, vector<128x128xbf16>, vector<8x128xf32> -> vector<8x128xf32>
    %13 = vector.broadcast %11 : vector<1x128xf32> to vector<8x128xf32>
    %14 = arith.addf %12, %13 : vector<8x128xf32>
    %cst_11 = arith.constant 0.000000e+00 : f32
    %15 = vector.broadcast %cst_11 : f32 to vector<8x128xf32>
    %16 = arith.maximumf %14, %15 : vector<8x128xf32>
    %17 = arith.truncf %16 : vector<8x128xf32> to vector<8x128xbf16>
    %c0_12 = arith.constant 0 : index
    %c0_13 = arith.constant 0 : index
    %18 = vector.load %arg6[%c0_12, %c0_13] : memref<128x16xbf16, #tpu.memory_space<vmem>>, vector<128x16xbf16>
    %c0_14 = arith.constant 0 : index
    %c0_15 = arith.constant 0 : index
    %19 = vector.load %arg7[%c0_14, %c0_15] : memref<1x16xf32, #tpu.memory_space<vmem>>, vector<1x16xf32>
    %cst_16 = arith.constant dense<0.000000e+00> : vector<8x16xf32>
    %20 = tpu.matmul %17, %18, %cst_16 {dimension_numbers = #tpu.dot_dimension_numbers<[1], [0], [0], [1], [0, 0, 1, 1], [], []>} : vector<8x128xbf16>, vector<128x16xbf16>, vector<8x16xf32> -> vector<8x16xf32>
    %21 = vector.broadcast %19 : vector<1x16xf32> to vector<8x16xf32>
    %22 = arith.addf %20, %21 : vector<8x16xf32>
    %c0_17 = arith.constant 0 : index
    %c0_18 = arith.constant 0 : index
    %23 = vector.load %arg8[%c0_17, %c0_18] : memref<8x16xf32, #tpu.memory_space<vmem>>, vector<8x16xf32>
    tpu.vector_store %arg8[%c0_17, %c0_18], %22 {strides = array<i32>} : memref<8x16xf32, #tpu.memory_space<vmem>>, vector<8x16xf32>,
    return
  }
  func.func @transform_0(%arg0: i32) -> (i32, i32) {
    %c0_i32 = arith.constant 0 : i32
    %c0_i32_0 = arith.constant 0 : i32
    return %arg0, %c0_i32 : i32, i32
  }
  func.func @transform_1(%arg0: i32) -> (i32, i32) {
    %c0_i32 = arith.constant 0 : i32
    %c0_i32_0 = arith.constant 0 : i32
    %c0_i32_1 = arith.constant 0 : i32
    return %c0_i32, %c0_i32_0 : i32, i32
  }
  func.func @transform_2(%arg0: i32) -> (i32, i32) {
    %c0_i32 = arith.constant 0 : i32
    %c0_i32_0 = arith.constant 0 : i32
    %c0_i32_1 = arith.constant 0 : i32
    return %c0_i32, %c0_i32_0 : i32, i32
  }
  func.func @transform_3(%arg0: i32) -> (i32, i32) {
    %c0_i32 = arith.constant 0 : i32
    %c0_i32_0 = arith.constant 0 : i32
    %c0_i32_1 = arith.constant 0 : i32
    return %c0_i32, %c0_i32_0 : i32, i32
  }
  func.func @transform_4(%arg0: i32) -> (i32, i32) {
    %c0_i32 = arith.constant 0 : i32
    %c0_i32_0 = arith.constant 0 : i32
    %c0_i32_1 = arith.constant 0 : i32
    return %c0_i32, %c0_i32_0 : i32, i32
  }
  func.func @transform_5(%arg0: i32) -> (i32, i32) {
    %c0_i32 = arith.constant 0 : i32
    %c0_i32_0 = arith.constant 0 : i32
    %c0_i32_1 = arith.constant 0 : i32
    return %c0_i32, %c0_i32_0 : i32, i32
  }
  func.func @transform_6(%arg0: i32) -> (i32, i32) {
    %c0_i32 = arith.constant 0 : i32
    %c0_i32_0 = arith.constant 0 : i32
    %c0_i32_1 = arith.constant 0 : i32
    return %c0_i32, %c0_i32_0 : i32, i32
  }
  func.func @transform_7(%arg0: i32) -> (i32, i32) {
    %c0_i32 = arith.constant 0 : i32
    %c0_i32_0 = arith.constant 0 : i32
    return %arg0, %c0_i32 : i32, i32
  }
}

module attributes {stable_mosaic.version = 11 : i64} {
  func.func @_mlp_kernel(%arg0: i32, %arg1: memref<8x32xf32, #tpu.memory_space<vmem>>, %arg2: memref<32x128xbf16, #tpu.memory_space<vmem>>, %arg3: memref<1x128xf32, #tpu.memory_space<vmem>>, %arg4: memref<128x128xbf16, #tpu.memory_space<vmem>>, %arg5: memref<1x128xf32, #tpu.memory_space<vmem>>, %arg6: memref<128x16xbf16, #tpu.memory_space<vmem>>, %arg7: memref<1x16xf32, #tpu.memory_space<vmem>>, %arg8: memref<8x16xf32, #tpu.memory_space<vmem>>) attributes {dimension_semantics = [#tpu.dimension_semantics<parallel>], iteration_bounds = array<i64: 2>, scalar_prefetch = 0 : i64, scratch_operands = 0 : i64, tpu.core_type = #tpu.core_type<tc>, window_params = [{transform_indices = @transform_0, window_bounds = array<i64: 8, 32>}, {pipeline_mode = #tpu.pipeline_mode<synchronous>, transform_indices = @transform_1, window_bounds = array<i64: 32, 128>}, {pipeline_mode = #tpu.pipeline_mode<synchronous>, transform_indices = @transform_2, window_bounds = array<i64: 1, 128>}, {pipeline_mode = #tpu.pipeline_mode<synchronous>, transform_indices = @transform_3, window_bounds = array<i64: 128, 128>}, {pipeline_mode = #tpu.pipeline_mode<synchronous>, transform_indices = @transform_4, window_bounds = array<i64: 1, 128>}, {pipeline_mode = #tpu.pipeline_mode<synchronous>, transform_indices = @transform_5, window_bounds = array<i64: 128, 16>}, {pipeline_mode = #tpu.pipeline_mode<synchronous>, transform_indices = @transform_6, window_bounds = array<i64: 1, 16>}, {transform_indices = @transform_7, window_bounds = array<i64: 8, 16>}]} {
    %c0 = arith.constant 0 : index
    %c0_0 = arith.constant 0 : index
    %0 = vector.load %arg1[%c0, %c0_0] : memref<8x32xf32, #tpu.memory_space<vmem>>, vector<8x32xf32>
    %1 = arith.truncf %0 : vector<8x32xf32> to vector<8x32xbf16>
    %c0_1 = arith.constant 0 : index
    %c0_2 = arith.constant 0 : index
    %2 = vector.load %arg2[%c0_1, %c0_2] : memref<32x128xbf16, #tpu.memory_space<vmem>>, vector<32x128xbf16>
    %c0_3 = arith.constant 0 : index
    %c0_4 = arith.constant 0 : index
    %3 = vector.load %arg3[%c0_3, %c0_4] : memref<1x128xf32, #tpu.memory_space<vmem>>, vector<1x128xf32>
    %cst = arith.constant dense<0.000000e+00> : vector<8x128xf32>
    %4 = tpu.matmul %1, %2, %cst {dimension_numbers = #tpu.dot_dimension_numbers<[1], [0], [0], [1], [0, 0, 1, 1], [], []>} : vector<8x32xbf16>, vector<32x128xbf16>, vector<8x128xf32> -> vector<8x128xf32>
    %5 = vector.broadcast %3 : vector<1x128xf32> to vector<8x128xf32>
    %6 = arith.addf %4, %5 : vector<8x128xf32>
    %cst_5 = arith.constant 0.000000e+00 : f32
    %7 = vector.broadcast %cst_5 : f32 to vector<8x128xf32>
    %8 = arith.maximumf %6, %7 : vector<8x128xf32>
    %9 = arith.truncf %8 : vector<8x128xf32> to vector<8x128xbf16>
    %c0_6 = arith.constant 0 : index
    %c0_7 = arith.constant 0 : index
    %10 = vector.load %arg4[%c0_6, %c0_7] : memref<128x128xbf16, #tpu.memory_space<vmem>>, vector<128x128xbf16>
    %c0_8 = arith.constant 0 : index
    %c0_9 = arith.constant 0 : index
    %11 = vector.load %arg5[%c0_8, %c0_9] : memref<1x128xf32, #tpu.memory_space<vmem>>, vector<1x128xf32>
    %cst_10 = arith.constant dense<0.000000e+00> : vector<8x128xf32>
    %12 = tpu.matmul %9, %10, %cst_10 {dimension_numbers = #tpu.dot_dimension_numbers<[1], [0], [0], [1], [0, 0, 1, 1], [], []>} : vector<8x128xbf16>, vector<128x128xbf16>, vector<8x128xf32> -> vector<8x128xf32>
    %13 = vector.broadcast %11 : vector<1x128xf32> to vector<8x128xf32>
    %14 = arith.addf %12, %13 : vector<8x128xf32>
    %cst_11 = arith.constant 0.000000e+00 : f32
    %15 = vector.broadcast %cst_11 : f32 to vector<8x128xf32>
    %16 = arith.maximumf %14, %15 : vector<8x128xf32>
    %17 = arith.truncf %16 : vector<8x128xf32> to vector<8x128xbf16>
    %c0_12 = arith.constant 0 : index
    %c0_13 = arith.constant 0 : index
    %18 = vector.load %arg6[%c0_12, %c0_13] : memref<128x16xbf16, #tpu.memory_space<vmem>>, vector<128x16xbf16>
    %c0_14 = arith.constant 0 : index
    %c0_15 = arith.constant 0 : index
    %19 = vector.load %arg7[%c0_14, %c0_15] : memref<1x16xf32, #tpu.memory_space<vmem>>, vector<1x16xf32>
    %cst_16 = arith.constant dense<0.000000e+00> : vector<8x16xf32>
    %20 = tpu.matmul %17, %18, %cst_16 {dimension_numbers = #tpu.dot_dimension_numbers<[1], [0], [0], [1], [0, 0, 1, 1], [], []>} : vector<8x128xbf16>, vector<128x16xbf16>, vector<8x16xf32> -> vector<8x16xf32>
    %21 = vector.broadcast %19 : vector<1x16xf32> to vector<8x16xf32>
    %22 = arith.addf %20, %21 : vector<8x16xf32>
    %c0_17 = arith.constant 0 : index
    %c0_18 = arith.constant 0 : index
    %23 = vector.load %arg8[%c0_17, %c0_18] : memref<8x16xf32, #tpu.memory_space<vmem>>, vector<8x16xf32>
    tpu.vector_store %arg8[%c0_17, %c0_18], %22 {strides = array<i32>} : memref<8x16xf32, #tpu.memory_space<vmem>>, vector<8x16xf32>,
    return
  }
  func.func @transform_0(%arg0: i32) -> (i32, i32) {
    %c0_i32 = arith.constant 0 : i32
    %c0_i32_0 = arith.constant 0 : i32
    return %arg0, %c0_i32 : i32, i32
  }
  func.func @transform_1(%arg0: i32) -> (i32, i32) {
    %c0_i32 = arith.constant 0 : i32
    %c0_i32_0 = arith.constant 0 : i32
    %c0_i32_1 = arith.constant 0 : i32
    return %c0_i32, %c0_i32_0 : i32, i32
  }
  func.func @transform_2(%arg0: i32) -> (i32, i32) {
    %c0_i32 = arith.constant 0 : i32
    %c0_i32_0 = arith.constant 0 : i32
    %c0_i32_1 = arith.constant 0 : i32
    return %c0_i32, %c0_i32_0 : i32, i32
  }
  func.func @transform_3(%arg0: i32) -> (i32, i32) {
    %c0_i32 = arith.constant 0 : i32
    %c0_i32_0 = arith.constant 0 : i32
    %c0_i32_1 = arith.constant 0 : i32
    return %c0_i32, %c0_i32_0 : i32, i32
  }
  func.func @transform_4(%arg0: i32) -> (i32, i32) {
    %c0_i32 = arith.constant 0 : i32
    %c0_i32_0 = arith.constant 0 : i32
    %c0_i32_1 = arith.constant 0 : i32
    return %c0_i32, %c0_i32_0 : i32, i32
  }
  func.func @transform_5(%arg0: i32) -> (i32, i32) {
    %c0_i32 = arith.constant 0 : i32
    %c0_i32_0 = arith.constant 0 : i32
    %c0_i32_1 = arith.constant 0 : i32
    return %c0_i32, %c0_i32_0 : i32, i32
  }
  func.func @transform_6(%arg0: i32) -> (i32, i32) {
    %c0_i32 = arith.constant 0 : i32
    %c0_i32_0 = arith.constant 0 : i32
    %c0_i32_1 = arith.constant 0 : i32
    return %c0_i32, %c0_i32_0 : i32, i32
  }
  func.func @transform_7(%arg0: i32) -> (i32, i32) {
    %c0_i32 = arith.constant 0 : i32
    %c0_i32_0 = arith.constant 0 : i32
    return %arg0, %c0_i32 : i32, i32
  }
}

</mosaic_0001>

<bundles_post_ra>
// kernel: tpu_custom_call.1
= control target key start
LH: loop header
LB: loop body
LE: loop exit
PB: predicated region body
PF: predicated region fallthrough
CT: control target
= control target key end

     0   :  { %s1307_s0 = inlined_call_operand.hbm [shape: f32[16,32], index: 0, kind: input, shape index: {}]   ;;  %s1308_s1 = inlined_call_operand.hbm [shape: bf16[32,128], index: 1, kind: input, shape index: {}]   ;;  %s1309_s2 = inlined_call_operand.vmem [shape: f32[1,128], index: 2, kind: input, shape index: {}]   ;;  %s1310_s3 = inlined_call_operand.vmem [shape: bf16[128,128], index: 3, kind: input, shape index: {}]   ;;  %s1311_s4 = inlined_call_operand.vmem [shape: f32[1,128], index: 4, kind: input, shape index: {}]   ;;  %s1312_s5 = inlined_call_operand.vmem [shape: bf16[128,16], index: 5, kind: input, shape index: {}]   ;;  %s1313_s6 = inlined_call_operand.vmem [shape: f32[1,16], index: 6, kind: input, shape index: {}]   ;;  %s1314_s7 = inlined_call_operand.hbm [shape: f32[16,16], index: 7, kind: output, shape index: {}]  }
   0x1   :  { %1319 = sst [smem:[#allocation12_spill]] %s1308_s1 }
   0x2   :  { %12 = vsyncpa [#allocation3], 0 }
   0x3   :  { %14 = vsyncpa [#allocation3 + $0x1], 0 }
   0x4   :  { %15 = vsyncpa [#allocation6], 0 }
   0x5   :  { %16 = vsyncpa [#allocation4], 0 }
   0x6   :  { %18 = vsyncpa [#allocation4 + $0x1], 0  ;;  %s1056_s24 = smov 0   ;;  %s1058_s25 = smov 0  }
   0x7   :  { %s1060_s26 = smov 0   ;;  %s1062_s27 = smov 0  }
   0x8 LB: > { %s1077_s28 = sadd.s32 4294967295, %s1007_s27   ;;  %s701_s29 = sadd.s32 4294967294, %s1007_s27   ;;  %s1007_s27 = sphi %s1062_s27, %s1340_s27   ;;  %s1003_s26 = sphi %s1060_s26, %s1339_s26   ;;  %s999_s25 = sphi %s1058_s25, %s1338_s25   ;;  %s995_s24 = sphi %s1056_s24, %s1337_s24  }
   0x9   : > { %p44_p0 = scmp.ne.s32.totalorder %s999_s25, %s995_s24  ;;  %p1315_p1 = scmp.eq.s32.totalorder %s1077_s28, 0 }
   0xa   : > { %p200_p3 = scmp.eq.s32.totalorder %s701_s29, 1  ;;  %p702_p5 = scmp.ge.s32.totalorder %s1007_s27, 1 }
   0xb   : > { %p1086_p4 = por %p1315_p1, %p44_p0  ;;  %p207_p7 = scmp.lt.s32.totalorder %s1007_s27, 3 }
   0xc   : > { %p1091_p6 = por %p200_p3, %p44_p0  ;;  %s1009_s10 = smov [#allocation5]  }
   0xd   : > { %s1320_s30 = scalar_select %p1086_p4, 1, 0 }
   0xe   : > { %s1321_s8 = scalar_select %p1091_p6, 1, 0 }
   0xf   : > { %p1096_p8 = pnand %p702_p5, %p207_p7  ;;  %s219_s11 = sshll.u32 %s1009_s10, 4  ;;  %s220_s11 = int_to_ptr.vmem [resolvable:$true] %s219_s11 }
  0x10   : > { %s1110_s13 = sadd.s32 1, %s1007_s27   ;;  %s31_s14 = sadd.s32 1, %s1003_s26 }
  0x11   : > { %s1322_s9 = scalar_select %p1096_p8, 1, 0 }
  0x12   : > { %p814_p9 = pneg %p1096_p8  ;;  %s28_s15 = ssub.s32 %s1007_s27, %s1110_s13 }
  0x13   : > { %s896_s16 = scalar_lea.vmem %s220_s11, 256  ;;  %p904_p5 = scmp.lt.s32.totalorder %s220_s11, %s220_s11 }
  0x14   : > { %p1105_p11 = pnand %p814_p9, %p1315_p1  ;;  %p897_p13 = scmp.ne.s32.totalorder %s220_s11, %s896_s16 }
  0x15   : > { %p905_p7 = scmp.lt.s32.totalorder %s896_s16, %s896_s16 }
  0x16   : > { %p887_p12 = pneg %p1105_p11 }
  0x17   : > { %p906_p10 = por %p905_p7, %p904_p5 }
  0x18   : > { %p899_p0 = pnand %p897_p13, %p887_p12 }
  0x1a   : > { %p900_p3 = pneg %p899_p0 }
  0x1c   : > { %p907_p2 = pnand %p906_p10, %p900_p3 }
  0x1e   : > { %910 = shalt.err (!%p907_p2)
}
  0x1f   : > { %s1010_s17 = smov 64   ;;  %s1011_s18 = smov 4  }
  0x20   : > { %s1324_s1 = sld [smem:[#allocation12_spill]]  ;;  %p29_p9 = scmp.eq.s32.totalorder %s28_s15, 0 }
  0x21   : > { %p38_p12 = scmp.ne.s32.totalorder %s1003_s26, %s999_s25  ;;  %p39_p10 = scmp.eq.s32.totalorder %s1007_s27, 0 }
  0x22   : > { %p827_p2 = scmp.lt.s32.totalorder %s1007_s27, 2  ;;  %p1326_p0 = scmp.eq.s32.totalorder %s1077_s28, 1 }
  0x23   : > { %s1127_s21 = scalar_select %p29_p9, %s1003_s26, %s31_s14  }
  0x24   : > { %p40_p13 = por %p39_p10, %p38_p12  ;;  %p1131_p3 = por %p1326_p0, %p38_p12 }
  0x25   : > { %1325 = sst [smem:[#allocation11_spill]] %s1127_s21  ;;  %s248_s23 = sand.u32 1, %s1003_s26  }
  0x26   : > { %817 = dma.hbm_to_vmem [thread:$0]  (!%p1105_p11), %s1324_s1, 256, %s220_s11, [#allocation6], %s1010_s17, %s1010_s17, %s1011_s18  }
  0x27   : > { %s1327_s22 = scalar_select %p1131_p3, 1, 0 }
  0x28   : > { %s706_s29 = sshll.u32 %s1007_s27, 7  ;;  %s705_s10 = sshll.u32 %s248_s23, 3 }
  0x29   : > { %s1140_s19 = scalar_lea.hbm %s1307_s0, %s706_s29  ;;  %s252_s11 = scalar_lea.vmem [#allocation2], %s705_s10 }
  0x2a   : > { %s259_s14 = sshll.u32 %s252_s11, 4  ;;  %p1142_p11 = pnand %p827_p2, %p40_p13  ;;  %s260_s14 = int_to_ptr.vmem [resolvable:$true] %s259_s14 }
  0x2b   : > { %s249_s17 = scalar_lea.sflag [#allocation3], %s248_s23  ;;  %s911_s18 = scalar_lea.hbm %s1140_s19, 128 }
  0x2c   : > { %p912_p5 = scmp.ne.s32.totalorder %s1140_s19, %s911_s18  ;;  %p913_p7 = pneg %p1142_p11 }
  0x2d   : > { %s916_s12 = scalar_lea.hbm %s1307_s0, 256  ;;  %p917_p10 = scmp.lt.s32.totalorder %s1140_s19, %s1307_s0 }
  0x2e   : > { %p914_p9 = pnand %p913_p7, %p912_p5  ;;  %p918_p2 = scmp.lt.s32.totalorder %s916_s12, %s911_s18 }
  0x30   : > { %p915_p12 = pneg %p914_p9  ;;  %p919_p13 = por %p918_p2, %p917_p10 }
  0x32   : > { %p920_p0 = pnand %p919_p13, %p915_p12 }
  0x34   : > { %923 = shalt.err (!%p920_p0)
}
  0x35   : > { %s924_s11 = scalar_lea.vmem %s260_s14, 128  ;;  %s1012_s23 = smov [#allocation2]  }
  0x36   : > { %p925_p1 = scmp.ne.s32.totalorder %s260_s14, %s924_s11  ;;  %s929_s1 = sshll.u32 %s1012_s23, 4  ;;  %s930_s1 = int_to_ptr.vmem [resolvable:$false] %s929_s1 }
  0x37   : > { %s931_s21 = scalar_lea.vmem %s930_s1, 256  ;;  %p932_p5 = scmp.lt.s32.totalorder %s260_s14, %s930_s1 }
  0x38   : > { %p927_p6 = pnand %p925_p1, %p913_p7  ;;  %p933_p9 = scmp.lt.s32.totalorder %s931_s21, %s924_s11 }
  0x3a   : > { %p928_p3 = pneg %p927_p6  ;;  %p934_p4 = por %p933_p9, %p932_p5 }
  0x3c   : > { %p935_p8 = pnand %p934_p4, %p928_p3 }
  0x3e   : > { %938 = shalt.err (!%p935_p8)
}
  0x3f   : > { %821 = dma.hbm_to_vmem [thread:$0]  (!%p1142_p11), %s1140_s19, 128, %s260_s14, %s249_s17  }
  0x40   : > { %p1329_p12 = scmp.ne.s32.totalorder %s1322_s9, 0 }
  0x41   : > { %s1163_s18 = sand.u32 (!%p1329_p12), 1, %s999_s25   ;;  %p1330_p1 = scmp.ne.s32.totalorder (!%p1329_p12), %s1320_s30, 0 }
  0x42   : > { %268 = sbr.rel (%p1329_p12) target bundleno = 692 (0x2b4), region = 48  ;;  %s708_s20 = sshll.u32 (!%p1329_p12), %s1163_s18, 3 }
  0x43   : > { %s271_s1 = scalar_lea.sflag (!%p1329_p12), [#allocation3], %s1163_s18  ;;  %s274_s21 = scalar_lea.vmem (!%p1329_p12), [#allocation2], %s708_s20 }
  0x47   : > { %982 = dma.done.wait (%p1330_p1), %s271_s1, 128  }
  0x48   : > { %984 = vsyncadd (%p1330_p1), %s271_s1, 4294967168  ;;  %p1331_p4 = scmp.eq.s32.totalorder %s1077_s28, 0 }
  0x4a   : > { %986 = dma.done.wait (%p1331_p4), [#allocation6], 256   ;;  %p1332_p6 = pmov %p1331_p4 }
  0x4b   : > { %v1013_v0 = vmov 0.0   ;;  %vm1014_vm0 = vmmov 0   ;;  %v867_v1 = vld [vmem:[#allocation5 + $0x8] sm:$0xff]   ;;  %v868_v2 = vld [vmem:[#allocation5] sm:$0xff]   ;;  %v310_v3 = vld [vmem:[%s274_s21] sm:$0xff]  ;;  %vm335_vm1 = vcmask 261120  }
  0x4c   : > { %988 = vsyncadd (%p1332_p6), [#allocation6], 4294967040  ;;  %758 = vmatprep.subr.bf16.mxu0 %v1013_v0  ;;  %762 = vmatprep.mubr.msk.bf16.mxu0 %vm1014_vm0, %v1013_v0  ;;  %v869_v4 = vld [vmem:[%s1310_s3 + $0x38] sm:$0xff]   ;;  %v311_v5 = vpack.c.bf16 %v310_v3, %v310_v3  ;;  %v870_v6 = vld [vmem:[%s1310_s3 + $0x30] sm:$0xff]   ;;  %s734_s11 = sshll.u32 %s1077_s28, 7  ;;  %s308_s23 = scalar_lea.vmem [#allocation7], %s708_s20 }
  0x4d   : > { %766 = vmatprep.subr.bf16.mxu1 %v1013_v0  ;;  %782 = vmatprep.mubr.msk.bf16.mxu1 %vm1014_vm0, %v1013_v0  ;;  %v871_v7 = vld [vmem:[%s1310_s3 + $0x28] sm:$0xff]   ;;  %v872_v8 = vld [vmem:[%s1310_s3 + $0x20] sm:$0xff]   ;;  %v873_v9 = vld [vmem:[%s1310_s3 + $0x18] sm:$0xff]   ;;  %s621_s1 = sshll.u32 %s308_s23, 4  ;;  %vm605_vm2 = vcmask 130048   ;;  %s1264_s9 = scalar_lea.hbm %s1314_s7, %s734_s11  ;;  %s1266_s1 = int_to_ptr.vmem [resolvable:$true] %s621_s1 }
  0x4e   : > { %759 = vmatpush3.bf16.msra.mxu0 %v867_v1  ;;  %767 = vmatpush3.bf16.msra.mxu1 %v869_v4  ;;  %v874_v10 = vld [vmem:[%s1310_s3 + $0x10] sm:$0xff]   ;;  %v875_v11 = vld [vmem:[%s1310_s3 + $0x8] sm:$0xff]   ;;  %v876_v12 = vld [vmem:[%s1310_s3] sm:$0xff]   ;;  %s608_s28 = scalar_lea.sflag [#allocation4], %s1163_s18  ;;  %s939_s19 = scalar_lea.vmem %s1266_s1, 128 }
  0x4f   : > { %760 = vmatprep.subr.bf16.mxu0 %v1013_v0  ;;  %768 = vmatprep.subr.bf16.mxu1 %v1013_v0  ;;  %v877_v13 = vld [vmem:[%s1312_s5 + $0x38] sm:$0xff]   ;;  %v878_v14 = vld [vmem:[%s1312_s5 + $0x30] sm:$0xff]   ;;  %v879_v15 = vld [vmem:[%s1312_s5 + $0x28] sm:$0xff]   ;;  %p940_p8 = scmp.ne.s32.totalorder %s1266_s1, %s939_s19  ;;  %p1333_p3 = scmp.ne.s32.totalorder %s1327_s22, 0 }
  0x50   : > { %v880_v16 = vld [vmem:[%s1312_s5 + $0x20] sm:$0xff]   ;;  %v881_v17 = vld [vmem:[%s1312_s5 + $0x18] sm:$0xff]   ;;  %v882_v18 = vld [vmem:[%s1312_s5 + $0x10] sm:$0xff]   ;;  %s1015_s20 = smov [#allocation7]  }
  0x51   : > { %v711_v19 = vld [vmem:[%s1309_s2] ss:$0 sm:$0xff]  ;;  %v883_v27 = vld [vmem:[%s1312_s5 + $0x8] sm:$0xff]   ;;  %p941_p11 = pnand %p940_p8, %p1333_p3  ;;  %s943_s14 = sshll.u32 %s1015_s20, 4  ;;  %s944_s14 = int_to_ptr.vmem [resolvable:$false] %s943_s14 }
  0x52   : > { %761 = vmatpush3.bf16.msra.mxu0 %v868_v2  ;;  %769 = vmatpush3.bf16.msra.mxu1 %v870_v6  ;;  %v884_v28 = vld [vmem:[%s1312_s5] sm:$0xff]   ;;  %s945_s15 = scalar_lea.vmem %s944_s14, 256  ;;  %p946_p10 = scmp.lt.s32.totalorder %s1266_s1, %s944_s14 }
  0x53   : > { %786 = vmatprep.subr.bf16.mxu0 %v1013_v0  ;;  %770 = vmatprep.subr.bf16.mxu1 %v1013_v0  ;;  %v715_v29 = vld [vmem:[%s1311_s4] ss:$0 sm:$0xff]  ;;  %p942_p7 = pneg %p941_p11  ;;  %p947_p2 = scmp.lt.s32.totalorder %s945_s15, %s939_s19 }
  0x54   : > { %v724_v37 = vld [vmem:[%s1313_s6] ss:$0 sm:$0xff] }
  0x55   : > { %763 = vmatmul.mubr.msk.bf16.vlgmr.msra.gmra.mxu0 %vm335_vm1, %v311_v5  ;;  %p948_p13 = por %p947_p2, %p946_p10 }
  0x56   : > { %802 = vmatprep.mubr.msk.bf16.mxu0 %vm1014_vm0, %v1013_v0  ;;  %771 = vmatpush3.bf16.msra.mxu1 %v871_v7 }
  0x57   : > { %772 = vmatprep.subr.bf16.mxu1 %v1013_v0  ;;  %787 = vmatpush3.bf16.msra.mxu0 %v877_v13  ;;  %p949_p0 = pnand %p948_p13, %p942_p7 }
  0x58   : > { %788 = vmatprep.subr.bf16.mxu0 %v1013_v0 }
  0x5a   : > { %773 = vmatpush3.bf16.msra.mxu1 %v872_v8 }
  0x5b   : > { %774 = vmatprep.subr.bf16.mxu1 %v1013_v0  ;;  %789 = vmatpush3.bf16.msra.mxu0 %v878_v14 }
  0x5c   : > { %790 = vmatprep.subr.bf16.mxu0 %v1013_v0 }
  0x5e   : > { %775 = vmatpush3.bf16.msra.mxu1 %v873_v9 }
  0x5f   : > { %776 = vmatprep.subr.bf16.mxu1 %v1013_v0  ;;  %791 = vmatpush3.bf16.msra.mxu0 %v879_v15 }
  0x60   : > { %792 = vmatprep.subr.bf16.mxu0 %v1013_v0 }
  0x62   : > { %777 = vmatpush3.bf16.msra.mxu1 %v874_v10 }
  0x63   : > { %778 = vmatprep.subr.bf16.mxu1 %v1013_v0  ;;  %793 = vmatpush3.bf16.msra.mxu0 %v880_v16 }
  0x64   : > { %794 = vmatprep.subr.bf16.mxu0 %v1013_v0 }
  0x66   : > { %779 = vmatpush3.bf16.msra.mxu1 %v875_v11 }
  0x67   : > { %780 = vmatprep.subr.bf16.mxu1 %v1013_v0  ;;  %795 = vmatpush3.bf16.msra.mxu0 %v881_v17 }
  0x68   : > { %796 = vmatprep.subr.bf16.mxu0 %v1013_v0 }
  0x6a   : > { %781 = vmatpush3.bf16.msra.mxu1 %v876_v12 }
  0x6b   : > { %797 = vmatpush3.bf16.msra.mxu0 %v882_v18 }
  0x6c   : > { %798 = vmatprep.subr.bf16.mxu0 %v1013_v0 }
  0x6f   : > { %799 = vmatpush3.bf16.msra.mxu0 %v883_v27 }
  0x70   : > { %800 = vmatprep.subr.bf16.mxu0 %v1013_v0 }
  0x73   : > { %801 = vmatpush3.bf16.msra.mxu0 %v884_v28 }
 0x115   : > { %v373_v20 = vpop.f32.mrf.mxu0 }
 0x116   : > { %v374_v21 = vadd.f32 %v711_v19, %v373_v20 }
 0x117   : > { %v764_v22 = vpop.f32.mrf.mxu0 }
 0x118   : > { %v379_v23 = vmax.f32 %v374_v21, 0.0 }
 0x119   : > { %v376_v24 = vpop.f32.mrf.mxu0 }
 0x11a   : > { %v380_v25 = vpack.c.bf16 %v379_v23, %v379_v23 }
 0x11b   : > { %v765_v26 = vpop.f32.mrf.mxu0 }
 0x11c   : > { %783 = vmatmul.mubr.bf16.vlgmr.msra.gmra.mxu1 %v380_v25 }
 0x1dc   : > { %v486_v30 = vpop.f32.mrf.mxu1 }
 0x1dd   : > { %v487_v31 = vadd.f32 %v715_v29, %v486_v30 }
 0x1de   : > { %v784_v32 = vpop.f32.mrf.mxu1 }
 0x1df   : > { %v492_v33 = vmax.f32 %v487_v31, 0.0 }
 0x1e0   : > { %v489_v34 = vpop.f32.mrf.mxu1 }
 0x1e1   : > { %v493_v35 = vpack.c.bf16 %v492_v33, %v492_v33 }
 0x1e2   : > { %v785_v36 = vpop.f32.mrf.mxu1 }
 0x1e3   : > { %803 = vmatmul.mubr.bf16.vlgmr.msra.gmra.mxu0 %v493_v35 }
 0x2a3   : > { %v599_v38 = vpop.f32.mrf.mxu0 }
 0x2a4   : > { %v600_v39 = vadd.f32 %v724_v37, %v599_v38 }
 0x2a5   : > { %v804_v40 = vpop.f32.mrf.mxu0 }
 0x2a6   : > { %606 = vst.msk [vmem:[%s308_s23] sm:$0xff] %vm605_vm2, %v600_v39 }
 0x2a7   : > { %v602_v41 = vpop.f32.mrf.mxu0 }
 0x2a8   : > { %952 = shalt.err (!%p949_p0)
}
 0x2a9   : > { %s953_s17 = scalar_lea.hbm %s1264_s9, 128  ;;  %s957_s12 = scalar_lea.hbm %s1314_s7, 256 }
 0x2aa   : > { %p954_p5 = scmp.ne.s32.totalorder %s1264_s9, %s953_s17  ;;  %p958_p1 = scmp.lt.s32.totalorder %s1264_s9, %s1314_s7 }
 0x2ab   : > { %p959_p4 = scmp.lt.s32.totalorder %s957_s12, %s953_s17 }
 0x2ac   : > { %p955_p9 = pnand %p954_p5, %p1333_p3 }
 0x2ad   : > { %p960_p6 = por %p959_p4, %p958_p1 }
 0x2ae   : > { %p956_p12 = pneg %p955_p9 }
 0x2b0   : > { %p961_p8 = pnand %p960_p6, %p956_p12 }
 0x2b2   : > { %964 = shalt.err (!%p961_p8)
}
 0x2b3   : > { %812 = dma.vmem_to_hbm [thread:$0]  (%p1333_p3), %s1266_s1, 128, %s1264_s9, %s608_s28   ;;  %v805_v42 = vpop.f32.mrf.mxu0 }
 0x2b4 PF: > { %s633_s11 = sand.u32 1, %s995_s24   ;;  %p1334_p11 = scmp.ne.s32.totalorder %s1321_s8, 0 }
 0x2b5   : > { %p1335_p7 = scmp.ge.s32.totalorder %s1007_s27, 2  ;;  %s634_s23 = scalar_lea.sflag [#allocation4], %s633_s11 }
 0x2b7   : > { %p823_p10 = pnand %p1335_p7, %p1334_p11 }
 0x2b9   : > { %p824_p2 = pneg %p823_p10 }
 0x2bb   : > { %990 = dma.done.wait (%p824_p2), %s634_s23, 128  }
 0x2bc   : > { %992 = vsyncadd (%p824_p2), %s634_s23, 4294967168  ;;  %s1336_s22 = sld [smem:[#allocation11_spill]]  ;;  %p21_p13 = scmp.ge.s32.totalorder %s1110_s13, 4  }
 0x2bd   : > { %s1337_s24 = smov %s999_s25  ;;  %s1338_s25 = smov %s1003_s26 }
 0x2be   : > { %s1340_s27 = smov %s1110_s13  ;;  %23 = sbr.rel (!%p21_p13) target bundleno = 8 (0x8), region = 97 }
 0x2c2   : > { %s1339_s26 = smov %s1336_s22 }
 0x2c3   :  { %639 = vsyncpa [#allocation3], 1 }
 0x2c4   :  { %641 = vsyncpa [#allocation3 + $0x1], 1 }
 0x2c5   :  { %642 = vsyncpa [#allocation6], 1 }
 0x2c6   :  { %643 = vsyncpa [#allocation4], 1 }
 0x2c7   :  { %645 = vsyncpa [#allocation4 + $0x1], 1 }

// kernel: tpu_custom_call.1
= control target key start
LH: loop header
LB: loop body
LE: loop exit
PB: predicated region body
PF: predicated region fallthrough
CT: control target
= control target key end

     0   :  { %s1307_s0 = inlined_call_operand.hbm [shape: f32[16,32], index: 0, kind: input, shape index: {}]   ;;  %s1308_s1 = inlined_call_operand.hbm [shape: bf16[32,128], index: 1, kind: input, shape index: {}]   ;;  %s1309_s2 = inlined_call_operand.vmem [shape: f32[1,128], index: 2, kind: input, shape index: {}]   ;;  %s1310_s3 = inlined_call_operand.vmem [shape: bf16[128,128], index: 3, kind: input, shape index: {}]   ;;  %s1311_s4 = inlined_call_operand.vmem [shape: f32[1,128], index: 4, kind: input, shape index: {}]   ;;  %s1312_s5 = inlined_call_operand.vmem [shape: bf16[128,16], index: 5, kind: input, shape index: {}]   ;;  %s1313_s6 = inlined_call_operand.vmem [shape: f32[1,16], index: 6, kind: input, shape index: {}]   ;;  %s1314_s7 = inlined_call_operand.hbm [shape: f32[16,16], index: 7, kind: output, shape index: {}]  }
   0x1   :  { %1319 = sst [smem:[#allocation12_spill]] %s1308_s1 }
   0x2   :  { %12 = vsyncpa [#allocation3], 0 }
   0x3   :  { %14 = vsyncpa [#allocation3 + $0x1], 0 }
   0x4   :  { %15 = vsyncpa [#allocation6], 0 }
   0x5   :  { %16 = vsyncpa [#allocation4], 0 }
   0x6   :  { %18 = vsyncpa [#allocation4 + $0x1], 0  ;;  %s1056_s24 = smov 0   ;;  %s1058_s25 = smov 0  }
   0x7   :  { %s1060_s26 = smov 0   ;;  %s1062_s27 = smov 0  }
   0x8 LB: > { %s1077_s28 = sadd.s32 4294967295, %s1007_s27   ;;  %s701_s29 = sadd.s32 4294967294, %s1007_s27   ;;  %s1007_s27 = sphi %s1062_s27, %s1340_s27   ;;  %s1003_s26 = sphi %s1060_s26, %s1339_s26   ;;  %s999_s25 = sphi %s1058_s25, %s1338_s25   ;;  %s995_s24 = sphi %s1056_s24, %s1337_s24  }
   0x9   : > { %p44_p0 = scmp.ne.s32.totalorder %s999_s25, %s995_s24  ;;  %p1315_p1 = scmp.eq.s32.totalorder %s1077_s28, 0 }
   0xa   : > { %p200_p3 = scmp.eq.s32.totalorder %s701_s29, 1  ;;  %p702_p5 = scmp.ge.s32.totalorder %s1007_s27, 1 }
   0xb   : > { %p1086_p4 = por %p1315_p1, %p44_p0  ;;  %p207_p7 = scmp.lt.s32.totalorder %s1007_s27, 3 }
   0xc   : > { %p1091_p6 = por %p200_p3, %p44_p0  ;;  %s1009_s10 = smov [#allocation5]  }
   0xd   : > { %s1320_s30 = scalar_select %p1086_p4, 1, 0 }
   0xe   : > { %s1321_s8 = scalar_select %p1091_p6, 1, 0 }
   0xf   : > { %p1096_p8 = pnand %p702_p5, %p207_p7  ;;  %s219_s11 = sshll.u32 %s1009_s10, 4  ;;  %s220_s11 = int_to_ptr.vmem [resolvable:$true] %s219_s11 }
  0x10   : > { %s1110_s13 = sadd.s32 1, %s1007_s27   ;;  %s31_s14 = sadd.s32 1, %s1003_s26 }
  0x11   : > { %s1322_s9 = scalar_select %p1096_p8, 1, 0 }
  0x12   : > { %p814_p9 = pneg %p1096_p8  ;;  %s28_s15 = ssub.s32 %s1007_s27, %s1110_s13 }
  0x13   : > { %s896_s16 = scalar_lea.vmem %s220_s11, 256  ;;  %p904_p5 = scmp.lt.s32.totalorder %s220_s11, %s220_s11 }
  0x14   : > { %p1105_p11 = pnand %p814_p9, %p1315_p1  ;;  %p897_p13 = scmp.ne.s32.totalorder %s220_s11, %s896_s16 }
  0x15   : > { %p905_p7 = scmp.lt.s32.totalorder %s896_s16, %s896_s16 }
  0x16   : > { %p887_p12 = pneg %p1105_p11 }
  0x17   : > { %p906_p10 = por %p905_p7, %p904_p5 }
  0x18   : > { %p899_p0 = pnand %p897_p13, %p887_p12 }
  0x1a   : > { %p900_p3 = pneg %p899_p0 }
  0x1c   : > { %p907_p2 = pnand %p906_p10, %p900_p3 }
  0x1e   : > { %910 = shalt.err (!%p907_p2)
}
  0x1f   : > { %s1010_s17 = smov 64   ;;  %s1011_s18 = smov 4  }
  0x20   : > { %s1324_s1 = sld [smem:[#allocation12_spill]]  ;;  %p29_p9 = scmp.eq.s32.totalorder %s28_s15, 0 }
  0x21   : > { %p38_p12 = scmp.ne.s32.totalorder %s1003_s26, %s999_s25  ;;  %p39_p10 = scmp.eq.s32.totalorder %s1007_s27, 0 }
  0x22   : > { %p827_p2 = scmp.lt.s32.totalorder %s1007_s27, 2  ;;  %p1326_p0 = scmp.eq.s32.totalorder %s1077_s28, 1 }
  0x23   : > { %s1127_s21 = scalar_select %p29_p9, %s1003_s26, %s31_s14  }
  0x24   : > { %p40_p13 = por %p39_p10, %p38_p12  ;;  %p1131_p3 = por %p1326_p0, %p38_p12 }
  0x25   : > { %1325 = sst [smem:[#allocation11_spill]] %s1127_s21  ;;  %s248_s23 = sand.u32 1, %s1003_s26  }
  0x26   : > { %817 = dma.hbm_to_vmem [thread:$0]  (!%p1105_p11), %s1324_s1, 256, %s220_s11, [#allocation6], %s1010_s17, %s1010_s17, %s1011_s18  }
  0x27   : > { %s1327_s22 = scalar_select %p1131_p3, 1, 0 }
  0x28   : > { %s706_s29 = sshll.u32 %s1007_s27, 7  ;;  %s705_s10 = sshll.u32 %s248_s23, 3 }
  0x29   : > { %s1140_s19 = scalar_lea.hbm %s1307_s0, %s706_s29  ;;  %s252_s11 = scalar_lea.vmem [#allocation2], %s705_s10 }
  0x2a   : > { %s259_s14 = sshll.u32 %s252_s11, 4  ;;  %p1142_p11 = pnand %p827_p2, %p40_p13  ;;  %s260_s14 = int_to_ptr.vmem [resolvable:$true] %s259_s14 }
  0x2b   : > { %s249_s17 = scalar_lea.sflag [#allocation3], %s248_s23  ;;  %s911_s18 = scalar_lea.hbm %s1140_s19, 128 }
  0x2c   : > { %p912_p5 = scmp.ne.s32.totalorder %s1140_s19, %s911_s18  ;;  %p913_p7 = pneg %p1142_p11 }
  0x2d   : > { %s916_s12 = scalar_lea.hbm %s1307_s0, 256  ;;  %p917_p10 = scmp.lt.s32.totalorder %s1140_s19, %s1307_s0 }
  0x2e   : > { %p914_p9 = pnand %p913_p7, %p912_p5  ;;  %p918_p2 = scmp.lt.s32.totalorder %s916_s12, %s911_s18 }
  0x30   : > { %p915_p12 = pneg %p914_p9  ;;  %p919_p13 = por %p918_p2, %p917_p10 }
  0x32   : > { %p920_p0 = pnand %p919_p13, %p915_p12 }
  0x34   : > { %923 = shalt.err (!%p920_p0)
}
  0x35   : > { %s924_s11 = scalar_lea.vmem %s260_s14, 128  ;;  %s1012_s23 = smov [#allocation2]  }
  0x36   : > { %p925_p1 = scmp.ne.s32.totalorder %s260_s14, %s924_s11  ;;  %s929_s1 = sshll.u32 %s1012_s23, 4  ;;  %s930_s1 = int_to_ptr.vmem [resolvable:$false] %s929_s1 }
  0x37   : > { %s931_s21 = scalar_lea.vmem %s930_s1, 256  ;;  %p932_p5 = scmp.lt.s32.totalorder %s260_s14, %s930_s1 }
  0x38   : > { %p927_p6 = pnand %p925_p1, %p913_p7  ;;  %p933_p9 = scmp.lt.s32.totalorder %s931_s21, %s924_s11 }
  0x3a   : > { %p928_p3 = pneg %p927_p6  ;;  %p934_p4 = por %p933_p9, %p932_p5 }
  0x3c   : > { %p935_p8 = pnand %p934_p4, %p928_p3 }
  0x3e   : > { %938 = shalt.err (!%p935_p8)
}
  0x3f   : > { %821 = dma.hbm_to_vmem [thread:$0]  (!%p1142_p11), %s1140_s19, 128, %s260_s14, %s249_s17  }
  0x40   : > { %p1329_p12 = scmp.ne.s32.totalorder %s1322_s9, 0 }
  0x41   : > { %s1163_s18 = sand.u32 (!%p1329_p12), 1, %s999_s25   ;;  %p1330_p1 = scmp.ne.s32.totalorder (!%p1329_p12), %s1320_s30, 0 }
  0x42   : > { %268 = sbr.rel (%p1329_p12) target bundleno = 692 (0x2b4), region = 48  ;;  %s708_s20 = sshll.u32 (!%p1329_p12), %s1163_s18, 3 }
  0x43   : > { %s271_s1 = scalar_lea.sflag (!%p1329_p12), [#allocation3], %s1163_s18  ;;  %s274_s21 = scalar_lea.vmem (!%p1329_p12), [#allocation2], %s708_s20 }
  0x47   : > { %982 = dma.done.wait (%p1330_p1), %s271_s1, 128  }
  0x48   : > { %984 = vsyncadd (%p1330_p1), %s271_s1, 4294967168  ;;  %p1331_p4 = scmp.eq.s32.totalorder %s1077_s28, 0 }
  0x4a   : > { %986 = dma.done.wait (%p1331_p4), [#allocation6], 256   ;;  %p1332_p6 = pmov %p1331_p4 }
  0x4b   : > { %v1013_v0 = vmov 0.0   ;;  %vm1014_vm0 = vmmov 0   ;;  %v867_v1 = vld [vmem:[#allocation5 + $0x8] sm:$0xff]   ;;  %v868_v2 = vld [vmem:[#allocation5] sm:$0xff]   ;;  %v310_v3 = vld [vmem:[%s274_s21] sm:$0xff]  ;;  %vm335_vm1 = vcmask 261120  }
  0x4c   : > { %988 = vsyncadd (%p1332_p6), [#allocation6], 4294967040  ;;  %758 = vmatprep.subr.bf16.mxu0 %v1013_v0  ;;  %762 = vmatprep.mubr.msk.bf16.mxu0 %vm1014_vm0, %v1013_v0  ;;  %v869_v4 = vld [vmem:[%s1310_s3 + $0x38] sm:$0xff]   ;;  %v311_v5 = vpack.c.bf16 %v310_v3, %v310_v3  ;;  %v870_v6 = vld [vmem:[%s1310_s3 + $0x30] sm:$0xff]   ;;  %s734_s11 = sshll.u32 %s1077_s28, 7  ;;  %s308_s23 = scalar_lea.vmem [#allocation7], %s708_s20 }
  0x4d   : > { %766 = vmatprep.subr.bf16.mxu1 %v1013_v0  ;;  %782 = vmatprep.mubr.msk.bf16.mxu1 %vm1014_vm0, %v1013_v0  ;;  %v871_v7 = vld [vmem:[%s1310_s3 + $0x28] sm:$0xff]   ;;  %v872_v8 = vld [vmem:[%s1310_s3 + $0x20] sm:$0xff]   ;;  %v873_v9 = vld [vmem:[%s1310_s3 + $0x18] sm:$0xff]   ;;  %s621_s1 = sshll.u32 %s308_s23, 4  ;;  %vm605_vm2 = vcmask 130048   ;;  %s1264_s9 = scalar_lea.hbm %s1314_s7, %s734_s11  ;;  %s1266_s1 = int_to_ptr.vmem [resolvable:$true] %s621_s1 }
  0x4e   : > { %759 = vmatpush3.bf16.msra.mxu0 %v867_v1  ;;  %767 = vmatpush3.bf16.msra.mxu1 %v869_v4  ;;  %v874_v10 = vld [vmem:[%s1310_s3 + $0x10] sm:$0xff]   ;;  %v875_v11 = vld [vmem:[%s1310_s3 + $0x8] sm:$0xff]   ;;  %v876_v12 = vld [vmem:[%s1310_s3] sm:$0xff]   ;;  %s608_s28 = scalar_lea.sflag [#allocation4], %s1163_s18  ;;  %s939_s19 = scalar_lea.vmem %s1266_s1, 128 }
  0x4f   : > { %760 = vmatprep.subr.bf16.mxu0 %v1013_v0  ;;  %768 = vmatprep.subr.bf16.mxu1 %v1013_v0  ;;  %v877_v13 = vld [vmem:[%s1312_s5 + $0x38] sm:$0xff]   ;;  %v878_v14 = vld [vmem:[%s1312_s5 + $0x30] sm:$0xff]   ;;  %v879_v15 = vld [vmem:[%s1312_s5 + $0x28] sm:$0xff]   ;;  %p940_p8 = scmp.ne.s32.totalorder %s1266_s1, %s939_s19  ;;  %p1333_p3 = scmp.ne.s32.totalorder %s1327_s22, 0 }
  0x50   : > { %v880_v16 = vld [vmem:[%s1312_s5 + $0x20] sm:$0xff]   ;;  %v881_v17 = vld [vmem:[%s1312_s5 + $0x18] sm:$0xff]   ;;  %v882_v18 = vld [vmem:[%s1312_s5 + $0x10] sm:$0xff]   ;;  %s1015_s20 = smov [#allocation7]  }
  0x51   : > { %v711_v19 = vld [vmem:[%s1309_s2] ss:$0 sm:$0xff]  ;;  %v883_v27 = vld [vmem:[%s1312_s5 + $0x8] sm:$0xff]   ;;  %p941_p11 = pnand %p940_p8, %p1333_p3  ;;  %s943_s14 = sshll.u32 %s1015_s20, 4  ;;  %s944_s14 = int_to_ptr.vmem [resolvable:$false] %s943_s14 }
  0x52   : > { %761 = vmatpush3.bf16.msra.mxu0 %v868_v2  ;;  %769 = vmatpush3.bf16.msra.mxu1 %v870_v6  ;;  %v884_v28 = vld [vmem:[%s1312_s5] sm:$0xff]   ;;  %s945_s15 = scalar_lea.vmem %s944_s14, 256  ;;  %p946_p10 = scmp.lt.s32.totalorder %s1266_s1, %s944_s14 }
  0x53   : > { %786 = vmatprep.subr.bf16.mxu0 %v1013_v0  ;;  %770 = vmatprep.subr.bf16.mxu1 %v1013_v0  ;;  %v715_v29 = vld [vmem:[%s1311_s4] ss:$0 sm:$0xff]  ;;  %p942_p7 = pneg %p941_p11  ;;  %p947_p2 = scmp.lt.s32.totalorder %s945_s15, %s939_s19 }
  0x54   : > { %v724_v37 = vld [vmem:[%s1313_s6] ss:$0 sm:$0xff] }
  0x55   : > { %763 = vmatmul.mubr.msk.bf16.vlgmr.msra.gmra.mxu0 %vm335_vm1, %v311_v5  ;;  %p948_p13 = por %p947_p2, %p946_p10 }
  0x56   : > { %802 = vmatprep.mubr.msk.bf16.mxu0 %vm1014_vm0, %v1013_v0  ;;  %771 = vmatpush3.bf16.msra.mxu1 %v871_v7 }
  0x57   : > { %772 = vmatprep.subr.bf16.mxu1 %v1013_v0  ;;  %787 = vmatpush3.bf16.msra.mxu0 %v877_v13  ;;  %p949_p0 = pnand %p948_p13, %p942_p7 }
  0x58   : > { %788 = vmatprep.subr.bf16.mxu0 %v1013_v0 }
  0x5a   : > { %773 = vmatpush3.bf16.msra.mxu1 %v872_v8 }
  0x5b   : > { %774 = vmatprep.subr.bf16.mxu1 %v1013_v0  ;;  %789 = vmatpush3.bf16.msra.mxu0 %v878_v14 }
  0x5c   : > { %790 = vmatprep.subr.bf16.mxu0 %v1013_v0 }
  0x5e   : > { %775 = vmatpush3.bf16.msra.mxu1 %v873_v9 }
  0x5f   : > { %776 = vmatprep.subr.bf16.mxu1 %v1013_v0  ;;  %791 = vmatpush3.bf16.msra.mxu0 %v879_v15 }
  0x60   : > { %792 = vmatprep.subr.bf16.mxu0 %v1013_v0 }
  0x62   : > { %777 = vmatpush3.bf16.msra.mxu1 %v874_v10 }
  0x63   : > { %778 = vmatprep.subr.bf16.mxu1 %v1013_v0  ;;  %793 = vmatpush3.bf16.msra.mxu0 %v880_v16 }
  0x64   : > { %794 = vmatprep.subr.bf16.mxu0 %v1013_v0 }
  0x66   : > { %779 = vmatpush3.bf16.msra.mxu1 %v875_v11 }
  0x67   : > { %780 = vmatprep.subr.bf16.mxu1 %v1013_v0  ;;  %795 = vmatpush3.bf16.msra.mxu0 %v881_v17 }
  0x68   : > { %796 = vmatprep.subr.bf16.mxu0 %v1013_v0 }
  0x6a   : > { %781 = vmatpush3.bf16.msra.mxu1 %v876_v12 }
  0x6b   : > { %797 = vmatpush3.bf16.msra.mxu0 %v882_v18 }
  0x6c   : > { %798 = vmatprep.subr.bf16.mxu0 %v1013_v0 }
  0x6f   : > { %799 = vmatpush3.bf16.msra.mxu0 %v883_v27 }
  0x70   : > { %800 = vmatprep.subr.bf16.mxu0 %v1013_v0 }
  0x73   : > { %801 = vmatpush3.bf16.msra.mxu0 %v884_v28 }
 0x115   : > { %v373_v20 = vpop.f32.mrf.mxu0 }
 0x116   : > { %v374_v21 = vadd.f32 %v711_v19, %v373_v20 }
 0x117   : > { %v764_v22 = vpop.f32.mrf.mxu0 }
 0x118   : > { %v379_v23 = vmax.f32 %v374_v21, 0.0 }
 0x119   : > { %v376_v24 = vpop.f32.mrf.mxu0 }
 0x11a   : > { %v380_v25 = vpack.c.bf16 %v379_v23, %v379_v23 }
 0x11b   : > { %v765_v26 = vpop.f32.mrf.mxu0 }
 0x11c   : > { %783 = vmatmul.mubr.bf16.vlgmr.msra.gmra.mxu1 %v380_v25 }
 0x1dc   : > { %v486_v30 = vpop.f32.mrf.mxu1 }
 0x1dd   : > { %v487_v31 = vadd.f32 %v715_v29, %v486_v30 }
 0x1de   : > { %v784_v32 = vpop.f32.mrf.mxu1 }
 0x1df   : > { %v492_v33 = vmax.f32 %v487_v31, 0.0 }
 0x1e0   : > { %v489_v34 = vpop.f32.mrf.mxu1 }
 0x1e1   : > { %v493_v35 = vpack.c.bf16 %v492_v33, %v492_v33 }
 0x1e2   : > { %v785_v36 = vpop.f32.mrf.mxu1 }
 0x1e3   : > { %803 = vmatmul.mubr.bf16.vlgmr.msra.gmra.mxu0 %v493_v35 }
 0x2a3   : > { %v599_v38 = vpop.f32.mrf.mxu0 }
 0x2a4   : > { %v600_v39 = vadd.f32 %v724_v37, %v599_v38 }
 0x2a5   : > { %v804_v40 = vpop.f32.mrf.mxu0 }
 0x2a6   : > { %606 = vst.msk [vmem:[%s308_s23] sm:$0xff] %vm605_vm2, %v600_v39 }
 0x2a7   : > { %v602_v41 = vpop.f32.mrf.mxu0 }
 0x2a8   : > { %952 = shalt.err (!%p949_p0)
}
 0x2a9   : > { %s953_s17 = scalar_lea.hbm %s1264_s9, 128  ;;  %s957_s12 = scalar_lea.hbm %s1314_s7, 256 }
 0x2aa   : > { %p954_p5 = scmp.ne.s32.totalorder %s1264_s9, %s953_s17  ;;  %p958_p1 = scmp.lt.s32.totalorder %s1264_s9, %s1314_s7 }
 0x2ab   : > { %p959_p4 = scmp.lt.s32.totalorder %s957_s12, %s953_s17 }
 0x2ac   : > { %p955_p9 = pnand %p954_p5, %p1333_p3 }
 0x2ad   : > { %p960_p6 = por %p959_p4, %p958_p1 }
 0x2ae   : > { %p956_p12 = pneg %p955_p9 }
 0x2b0   : > { %p961_p8 = pnand %p960_p6, %p956_p12 }
 0x2b2   : > { %964 = shalt.err (!%p961_p8)
}
 0x2b3   : > { %812 = dma.vmem_to_hbm [thread:$0]  (%p1333_p3), %s1266_s1, 128, %s1264_s9, %s608_s28   ;;  %v805_v42 = vpop.f32.mrf.mxu0 }
 0x2b4 PF: > { %s633_s11 = sand.u32 1, %s995_s24   ;;  %p1334_p11 = scmp.ne.s32.totalorder %s1321_s8, 0 }
 0x2b5   : > { %p1335_p7 = scmp.ge.s32.totalorder %s1007_s27, 2  ;;  %s634_s23 = scalar_lea.sflag [#allocation4], %s633_s11 }
 0x2b7   : > { %p823_p10 = pnand %p1335_p7, %p1334_p11 }
 0x2b9   : > { %p824_p2 = pneg %p823_p10 }
 0x2bb   : > { %990 = dma.done.wait (%p824_p2), %s634_s23, 128  }
 0x2bc   : > { %992 = vsyncadd (%p824_p2), %s634_s23, 4294967168  ;;  %s1336_s22 = sld [smem:[#allocation11_spill]]  ;;  %p21_p13 = scmp.ge.s32.totalorder %s1110_s13, 4  }
 0x2bd   : > { %s1337_s24 = smov %s999_s25  ;;  %s1338_s25 = smov %s1003_s26 }
 0x2be   : > { %s1340_s27 = smov %s1110_s13  ;;  %23 = sbr.rel (!%p21_p13) target bundleno = 8 (0x8), region = 97 }
 0x2c2   : > { %s1339_s26 = smov %s1336_s22 }
 0x2c3   :  { %639 = vsyncpa [#allocation3], 1 }
 0x2c4   :  { %641 = vsyncpa [#allocation3 + $0x1], 1 }
 0x2c5   :  { %642 = vsyncpa [#allocation6], 1 }
 0x2c6   :  { %643 = vsyncpa [#allocation4], 1 }
 0x2c7   :  { %645 = vsyncpa [#allocation4 + $0x1], 1 }

</bundles_post_ra>
